<compile_context>
chip_gen: v7x
topology: tpu7x:2x2x1
jax: 0.10.0
libtpu: 0.0.40
codegen_flags: <defaults>
</compile_context>

<pallas_src>
import functools

import jax
import jax.numpy as jnp
from jax import lax
from jax.experimental import pallas as pl
from jax.experimental.pallas import tpu as pltpu

EPS = 1e-5


def _residual_block_kernel(x_ref, m1_ref, m2_ref, bsum_ref,
                           mask_up_ref, mask_dn_ref,
                           g1_ref, b1_ref, g2_ref, b2_ref,
                           out_ref):
    """Fused conv1 -> BN1 -> relu -> conv2 -> BN2 -> residual add.

    Layout: activations are (N*H, W*C) with lane index = w*C + c.

    x_ref        : (R, L)  f32   lane-dense input (also the residual)
    m*_ref       : (3L, L) bf16  kh-stacked banded block weight matrix
    bsum_ref     : (L, L)  f32   channel sum/broadcast matrix, pre-scaled by 1/(N*H*W)
    mask_up/dn   : (R, 1)  f32   validity of row r-1 / r+1 within the same image
    g*/b*        : (1, L)  f32   BN gamma / beta tiled across w
    out_ref      : (R, L)  f32
    """
    R = x_ref.shape[0]

    x = x_ref[...]                                            # (R, L) f32
    mask_up = mask_up_ref[...]                                # (R, 1) f32
    mask_dn = mask_dn_ref[...]                                # (R, 1) f32

    def conv3x3(z, m_ref):
        # kh taps via sublane rolls on the otherwise-idle XLU; image-boundary
        # rows are zeroed with precomputed multiplicative masks. The three
        # taps are concatenated along lanes (K = 3L) and contracted against
        # the pre-stacked banded weights in ONE bf16 MXU matmul (f32 acc).
        up = pltpu.roll(z, shift=1, axis=0) * mask_up          # row r reads z[r-1]
        dn = pltpu.roll(z, shift=R - 1, axis=0) * mask_dn      # row r reads z[r+1]
        big = jnp.concatenate([up, z, dn], axis=1).astype(jnp.bfloat16)  # (R, 3L)
        return jnp.dot(big, m_ref[...], preferred_element_type=jnp.float32)

    def batchnorm(z, g_ref, b_ref):
        # Single pass: per-lane sum and sum-of-squares stacked into one (2, L)
        # operand; one small f32 matmul against the (1/P-scaled) channel-sum
        # matrix both reduces over the interleaved w-groups and broadcasts the
        # per-channel stats back to every lane.
        s12 = jnp.concatenate(
            [jnp.sum(z, axis=0, keepdims=True),
             jnp.sum(z * z, axis=0, keepdims=True)], axis=0)   # (2, L) f32
        stats = jnp.dot(s12, bsum_ref[...],
                        preferred_element_type=jnp.float32)    # (2, L)
        mean = stats[0:1, :]
        var = stats[1:2, :] - mean * mean
        inv = lax.rsqrt(var + EPS)
        return (z - mean) * (inv * g_ref[...]) + b_ref[...]

    y1 = jnp.maximum(batchnorm(conv3x3(x, m1_ref), g1_ref, b1_ref), 0.0)
    y2 = batchnorm(conv3x3(y1, m2_ref), g2_ref, b2_ref)
    out_ref[...] = (x + y2).astype(out_ref.dtype)


def _banded_weights(w_oihw, W_sp, C):
    """OIHW 3x3 conv weight -> (3*W*C, W*C) bf16 kh-stacked banded block matrix.

    For kh tap dh (stacked at rows [dh*L, (dh+1)*L)):
      M[dh*L + w_in*C + ci, w_out*C + co] = w[co, ci, dh, w_in - w_out + 1]
      when |w_in - w_out| <= 1, else 0.
    The w-direction zero padding is implicit (missing blocks are zeros).
    """
    L = W_sp * C
    w_k = jnp.transpose(w_oihw, (2, 3, 1, 0)).astype(jnp.float32)  # (kh,kw,ci,co)
    lane = jnp.arange(L)
    ci = (lane % C)[:, None]                                   # (L, 1)
    co = (lane % C)[None, :]                                   # (1, L)
    kw = (lane // C)[:, None] - (lane // C)[None, :] + 1       # (L, L)
    valid = (kw >= 0) & (kw <= 2)
    kw_c = jnp.clip(kw, 0, 2)
    mats = [jnp.where(valid, w_k[dh][kw_c, ci, co], 0.0) for dh in range(3)]
    return jnp.concatenate(mats, axis=0).astype(jnp.bfloat16)   # (3L, L)


@jax.jit
def residual_block_forward(x_nchw, w1_oihw, w2_oihw, g1, b1, g2, b2):
    """Pallas-backed ResidualBlock forward.  x_nchw: (N, C, H, W) float32."""
    N, C, H, W = x_nchw.shape
    L = W * C
    R = N * H
    P = N * H * W

    # NCHW -> lane-dense (N*H, W*C).
    x_flat = jnp.transpose(x_nchw, (0, 2, 3, 1)).reshape(R, L)

    m1 = _banded_weights(w1_oihw, W, C)            # (3L, L) bf16
    m2 = _banded_weights(w2_oihw, W, C)

    # Channel sum/broadcast matrix, pre-scaled by 1/P: (s @ bsum)[w*C+c] is the
    # per-channel mean (or E[z^2]) replicated on every lane of that channel.
    lane = jnp.arange(L)
    bsum = ((lane[:, None] % C) == (lane[None, :] % C)).astype(jnp.float32) / P

    # Image-boundary masks for the kh = 0 / 2 taps (valid iff row r-1 / r+1
    # belongs to the same image). Constant given the static shapes.
    h_idx = jnp.arange(R, dtype=jnp.int32) % H
    mask_up = (h_idx >= 1).astype(jnp.float32).reshape(R, 1)
    mask_dn = (h_idx <= H - 2).astype(jnp.float32).reshape(R, 1)

    g1f = jnp.tile(g1.astype(jnp.float32), W).reshape(1, L)
    b1f = jnp.tile(b1.astype(jnp.float32), W).reshape(1, L)
    g2f = jnp.tile(g2.astype(jnp.float32), W).reshape(1, L)
    b2f = jnp.tile(b2.astype(jnp.float32), W).reshape(1, L)

    # Advisory cost: count the MXU work actually issued (banded K=3L matmuls).
    conv_flops = 2 * 2 * R * (3 * L) * L                  # two fused long-K convs
    bn_flops = 2 * (2 * 2 * L * L + 10 * R * L)           # stats matmul + elementwise
    cost = pl.CostEstimate(
        flops=int(conv_flops + bn_flops),
        transcendentals=int(2 * L),
        bytes_accessed=int(4 * (2 * R * L + L * L + 4 * L + 2 * R)
                           + 2 * (2 * 3 * L * L)))

    vmem = pl.BlockSpec(memory_space=pltpu.MemorySpace.VMEM)
    out_flat = pl.pallas_call(
        _residual_block_kernel,
        out_shape=jax.ShapeDtypeStruct((R, L), jnp.float32),
        in_specs=[vmem] * 10,
        out_specs=vmem,
        cost_estimate=cost,
    )(x_flat, m1, m2, bsum, mask_up, mask_dn, g1f, b1f, g2f, b2f)

    return jnp.transpose(out_flat.reshape(N, H, W, C), (0, 3, 1, 2))


def residual_block_reference(x_nchw, w1_oihw, w2_oihw, g1, b1, g2, b2):
    """Pure-JAX f32 reference mirroring the PyTorch forward (training-mode BN)."""
    def conv_bn(x, w, g, b):
        y = lax.conv_general_dilated(
            x, w, window_strides=(1, 1), padding=((1, 1), (1, 1)),
            dimension_numbers=("NCHW", "OIHW", "NCHW"))
        mean = jnp.mean(y, axis=(0, 2, 3), keepdims=True)
        var = jnp.mean((y - mean) ** 2, axis=(0, 2, 3), keepdims=True)
        return ((y - mean) * lax.rsqrt(var + EPS)
                * g.reshape(1, -1, 1, 1) + b.reshape(1, -1, 1, 1))

    y = jax.nn.relu(conv_bn(x_nchw, w1_oihw, g1, b1))
    return x_nchw + conv_bn(y, w2_oihw, g2, b2)


if __name__ == "__main__":
    # Small shapes consistent with the module (conv_dim=8); W*C = 128 lane-dense.
    N, C, H, W = 2, 8, 16, 16

    key = jax.random.PRNGKey(0)
    kx, kw1, kw2 = jax.random.split(key, 3)

    x = jax.random.normal(kx, (N, C, H, W), dtype=jnp.float32)

    # Conv2d weights (OIHW, no bias); BN gamma=1, beta=0 (fresh BatchNorm2d).
    w1 = jax.random.normal(kw1, (C, C, 3, 3), dtype=jnp.float32) * 0.1
    w2 = jax.random.normal(kw2, (C, C, 3, 3), dtype=jnp.float32) * 0.1
    g1 = jnp.ones((C,), jnp.float32)
    b1 = jnp.zeros((C,), jnp.float32)
    g2 = jnp.ones((C,), jnp.float32)
    b2 = jnp.zeros((C,), jnp.float32)

    out = residual_block_forward(x, w1, w2, g1, b1, g2, b2)
    jax.block_until_ready(out)

    ref = residual_block_reference(x, w1, w2, g1, b1, g2, b2)
    assert out.shape == (N, C, H, W)
    # Tolerance reflects explicit bf16 MXU operands vs. the f32 reference
    # (two stacked 3x3 convs + BN); observed error is well inside this.
    assert jnp.allclose(out, ref, atol=3e-2, rtol=3e-2), (
        float(jnp.max(jnp.abs(out - ref))))

    print("KERNEL_OK")
</pallas_src>

<mosaic_0001>
module attributes {stable_mosaic.version = 11 : i64} {
  func.func @_residual_block_kernel(%arg0: memref<32x128xf32, #tpu.memory_space<vmem>>, %arg1: memref<384x128xbf16, #tpu.memory_space<vmem>>, %arg2: memref<384x128xbf16, #tpu.memory_space<vmem>>, %arg3: memref<128x128xf32, #tpu.memory_space<vmem>>, %arg4: memref<32x1xf32, #tpu.memory_space<vmem>>, %arg5: memref<32x1xf32, #tpu.memory_space<vmem>>, %arg6: memref<1x128xf32, #tpu.memory_space<vmem>>, %arg7: memref<1x128xf32, #tpu.memory_space<vmem>>, %arg8: memref<1x128xf32, #tpu.memory_space<vmem>>, %arg9: memref<1x128xf32, #tpu.memory_space<vmem>>, %arg10: memref<32x128xf32, #tpu.memory_space<vmem>>) attributes {dimension_semantics = [], scalar_prefetch = 0 : i64, scratch_operands = 0 : i64, tpu.core_type = #tpu.core_type<tc>} {
    %c0 = arith.constant 0 : index
    %c0_0 = arith.constant 0 : index
    %0 = vector.load %arg0[%c0, %c0_0] : memref<32x128xf32, #tpu.memory_space<vmem>>, vector<32x128xf32>
    %c0_1 = arith.constant 0 : index
    %c0_2 = arith.constant 0 : index
    %1 = vector.load %arg4[%c0_1, %c0_2] : memref<32x1xf32, #tpu.memory_space<vmem>>, vector<32x1xf32>
    %c0_3 = arith.constant 0 : index
    %c0_4 = arith.constant 0 : index
    %2 = vector.load %arg5[%c0_3, %c0_4] : memref<32x1xf32, #tpu.memory_space<vmem>>, vector<32x1xf32>
    %c1_i32 = arith.constant 1 : i32
    %3 = tpu.dynamic_rotate %0 by %c1_i32 dim 0 : vector<32x128xf32>, i32 -> vector<32x128xf32>
    %4 = vector.broadcast %1 : vector<32x1xf32> to vector<32x128xf32>
    %5 = arith.mulf %3, %4 : vector<32x128xf32>
    %c31_i32 = arith.constant 31 : i32
    %6 = tpu.dynamic_rotate %0 by %c31_i32 dim 0 : vector<32x128xf32>, i32 -> vector<32x128xf32>
    %7 = vector.broadcast %2 : vector<32x1xf32> to vector<32x128xf32>
    %8 = arith.mulf %6, %7 : vector<32x128xf32>
    %9 = tpu.concatenate %5, %0, %8 in 1 : vector<32x128xf32>, vector<32x128xf32>, vector<32x128xf32> -> vector<32x384xf32>
    %10 = arith.truncf %9 : vector<32x384xf32> to vector<32x384xbf16>
    %c0_5 = arith.constant 0 : index
    %c0_6 = arith.constant 0 : index
    %11 = vector.load %arg1[%c0_5, %c0_6] : memref<384x128xbf16, #tpu.memory_space<vmem>>, vector<384x128xbf16>
    %cst = arith.constant dense<0.000000e+00> : vector<32x128xf32>
    %12 = tpu.matmul %10, %11, %cst {dimension_numbers = #tpu.dot_dimension_numbers<[1], [0], [0], [1], [0, 0, 1, 1], [], []>} : vector<32x384xbf16>, vector<384x128xbf16>, vector<32x128xf32> -> vector<32x128xf32>
    %cst_7 = arith.constant dense<0.000000e+00> : vector<128xf32>
    %13 = vector.multi_reduction <add>, %12, %cst_7 [0] : vector<32x128xf32> to vector<128xf32>
    %14 = vector.shape_cast %13 : vector<128xf32> to vector<1x128xf32>
    %15 = arith.mulf %12, %12 : vector<32x128xf32>
    %cst_8 = arith.constant dense<0.000000e+00> : vector<128xf32>
    %16 = vector.multi_reduction <add>, %15, %cst_8 [0] : vector<32x128xf32> to vector<128xf32>
    %17 = vector.shape_cast %16 : vector<128xf32> to vector<1x128xf32>
    %18 = tpu.concatenate %14, %17 in 0 : vector<1x128xf32>, vector<1x128xf32> -> vector<2x128xf32>
    %c0_9 = arith.constant 0 : index
    %c0_10 = arith.constant 0 : index
    %19 = vector.load %arg3[%c0_9, %c0_10] : memref<128x128xf32, #tpu.memory_space<vmem>>, vector<128x128xf32>
    %cst_11 = arith.constant dense<0.000000e+00> : vector<2x128xf32>
    %20 = tpu.matmul %18, %19, %cst_11 {dimension_numbers = #tpu.dot_dimension_numbers<[1], [0], [0], [1], [0, 0, 1, 1], [], []>} : vector<2x128xf32>, vector<128x128xf32>, vector<2x128xf32> -> vector<2x128xf32>
    %21 = vector.extract_strided_slice %20 {offsets = [0, 0], sizes = [1, 128], strides = [1, 1]} : vector<2x128xf32> to vector<1x128xf32>
    %22 = vector.extract_strided_slice %20 {offsets = [1, 0], sizes = [1, 128], strides = [1, 1]} : vector<2x128xf32> to vector<1x128xf32>
    %23 = arith.mulf %21, %21 : vector<1x128xf32>
    %24 = arith.subf %22, %23 : vector<1x128xf32>
    %cst_12 = arith.constant 9.99999974E-6 : f32
    %25 = vector.broadcast %cst_12 : f32 to vector<1x128xf32>
    %26 = arith.addf %24, %25 : vector<1x128xf32>
    %27 = math.rsqrt %26 : vector<1x128xf32>
    %28 = vector.broadcast %21 : vector<1x128xf32> to vector<32x128xf32>
    %29 = arith.subf %12, %28 : vector<32x128xf32>
    %c0_13 = arith.constant 0 : index
    %c0_14 = arith.constant 0 : index
    %30 = vector.load %arg6[%c0_13, %c0_14] : memref<1x128xf32, #tpu.memory_space<vmem>>, vector<1x128xf32>
    %31 = arith.mulf %27, %30 : vector<1x128xf32>
    %32 = vector.broadcast %31 : vector<1x128xf32> to vector<32x128xf32>
    %33 = arith.mulf %29, %32 : vector<32x128xf32>
    %c0_15 = arith.constant 0 : index
    %c0_16 = arith.constant 0 : index
    %34 = vector.load %arg7[%c0_15, %c0_16] : memref<1x128xf32, #tpu.memory_space<vmem>>, vector<1x128xf32>
    %35 = vector.broadcast %34 : vector<1x128xf32> to vector<32x128xf32>
    %36 = arith.addf %33, %35 : vector<32x128xf32>
    %cst_17 = arith.constant 0.000000e+00 : f32
    %37 = vector.broadcast %cst_17 : f32 to vector<32x128xf32>
    %38 = arith.maximumf %36, %37 : vector<32x128xf32>
    %c1_i32_18 = arith.constant 1 : i32
    %39 = tpu.dynamic_rotate %38 by %c1_i32_18 dim 0 : vector<32x128xf32>, i32 -> vector<32x128xf32>
    %40 = vector.broadcast %1 : vector<32x1xf32> to vector<32x128xf32>
    %41 = arith.mulf %39, %40 : vector<32x128xf32>
    %c31_i32_19 = arith.constant 31 : i32
    %42 = tpu.dynamic_rotate %38 by %c31_i32_19 dim 0 : vector<32x128xf32>, i32 -> vector<32x128xf32>
    %43 = vector.broadcast %2 : vector<32x1xf32> to vector<32x128xf32>
    %44 = arith.mulf %42, %43 : vector<32x128xf32>
    %45 = tpu.concatenate %41, %38, %44 in 1 : vector<32x128xf32>, vector<32x128xf32>, vector<32x128xf32> -> vector<32x384xf32>
    %46 = arith.truncf %45 : vector<32x384xf32> to vector<32x384xbf16>
    %c0_20 = arith.constant 0 : index
    %c0_21 = arith.constant 0 : index
    %47 = vector.load %arg2[%c0_20, %c0_21] : memref<384x128xbf16, #tpu.memory_space<vmem>>, vector<384x128xbf16>
    %cst_22 = arith.constant dense<0.000000e+00> : vector<32x128xf32>
    %48 = tpu.matmul %46, %47, %cst_22 {dimension_numbers = #tpu.dot_dimension_numbers<[1], [0], [0], [1], [0, 0, 1, 1], [], []>} : vector<32x384xbf16>, vector<384x128xbf16>, vector<32x128xf32> -> vector<32x128xf32>
    %cst_23 = arith.constant dense<0.000000e+00> : vector<128xf32>
    %49 = vector.multi_reduction <add>, %48, %cst_23 [0] : vector<32x128xf32> to vector<128xf32>
    %50 = vector.shape_cast %49 : vector<128xf32> to vector<1x128xf32>
    %51 = arith.mulf %48, %48 : vector<32x128xf32>
    %cst_24 = arith.constant dense<0.000000e+00> : vector<128xf32>
    %52 = vector.multi_reduction <add>, %51, %cst_24 [0] : vector<32x128xf32> to vector<128xf32>
    %53 = vector.shape_cast %52 : vector<128xf32> to vector<1x128xf32>
    %54 = tpu.concatenate %50, %53 in 0 : vector<1x128xf32>, vector<1x128xf32> -> vector<2x128xf32>
    %c0_25 = arith.constant 0 : index
    %c0_26 = arith.constant 0 : index
    %55 = vector.load %arg3[%c0_25, %c0_26] : memref<128x128xf32, #tpu.memory_space<vmem>>, vector<128x128xf32>
    %cst_27 = arith.constant dense<0.000000e+00> : vector<2x128xf32>
    %56 = tpu.matmul %54, %55, %cst_27 {dimension_numbers = #tpu.dot_dimension_numbers<[1], [0], [0], [1], [0, 0, 1, 1], [], []>} : vector<2x128xf32>, vector<128x128xf32>, vector<2x128xf32> -> vector<2x128xf32>
    %57 = vector.extract_strided_slice %56 {offsets = [0, 0], sizes = [1, 128], strides = [1, 1]} : vector<2x128xf32> to vector<1x128xf32>
    %58 = vector.extract_strided_slice %56 {offsets = [1, 0], sizes = [1, 128], strides = [1, 1]} : vector<2x128xf32> to vector<1x128xf32>
    %59 = arith.mulf %57, %57 : vector<1x128xf32>
    %60 = arith.subf %58, %59 : vector<1x128xf32>
    %cst_28 = arith.constant 9.99999974E-6 : f32
    %61 = vector.broadcast %cst_28 : f32 to vector<1x128xf32>
    %62 = arith.addf %60, %61 : vector<1x128xf32>
    %63 = math.rsqrt %62 : vector<1x128xf32>
    %64 = vector.broadcast %57 : vector<1x128xf32> to vector<32x128xf32>
    %65 = arith.subf %48, %64 : vector<32x128xf32>
    %c0_29 = arith.constant 0 : index
    %c0_30 = arith.constant 0 : index
    %66 = vector.load %arg8[%c0_29, %c0_30] : memref<1x128xf32, #tpu.memory_space<vmem>>, vector<1x128xf32>
    %67 = arith.mulf %63, %66 : vector<1x128xf32>
    %68 = vector.broadcast %67 : vector<1x128xf32> to vector<32x128xf32>
    %69 = arith.mulf %65, %68 : vector<32x128xf32>
    %c0_31 = arith.constant 0 : index
    %c0_32 = arith.constant 0 : index
    %70 = vector.load %arg9[%c0_31, %c0_32] : memref<1x128xf32, #tpu.memory_space<vmem>>, vector<1x128xf32>
    %71 = vector.broadcast %70 : vector<1x128xf32> to vector<32x128xf32>
    %72 = arith.addf %69, %71 : vector<32x128xf32>
    %73 = arith.addf %0, %72 : vector<32x128xf32>
    %c0_33 = arith.constant 0 : index
    %c0_34 = arith.constant 0 : index
    %74 = vector.load %arg10[%c0_33, %c0_34] : memref<32x128xf32, #tpu.memory_space<vmem>>, vector<32x128xf32>
    tpu.vector_store %arg10[%c0_33, %c0_34], %73 {strides = array<i32>} : memref<32x128xf32, #tpu.memory_space<vmem>>, vector<32x128xf32>,
    return
  }
}

</mosaic_0001>

<bundles_post_ra>
// kernel: tile.23
= control target key start
LH: loop header
LB: loop body
LE: loop exit
PB: predicated region body
PF: predicated region fallthrough
CT: control target
= control target key end

     0   :  { %s28_s0 = inlined_call_operand.vmem [shape: f32[8], index: 0, kind: input, shape index: {}]   ;;  %s29_s1 = inlined_call_operand.vmem [shape: f32[16,8], index: 1, kind: output, shape index: {}]  }
   0x1   :  { %v4_v0 = vld [vmem:[%s28_s0] ss:$0 sm:$0xff] }
   0x2   :  { %5 = vst [vmem:[%s29_s1] sm:$0xff] %v4_v0  ;;  %8 = vst [vmem:[%s29_s1 + $0x8] sm:$0xff] %v4_v0 }

// kernel: tile.24
= control target key start
LH: loop header
LB: loop body
LE: loop exit
PB: predicated region body
PF: predicated region fallthrough
CT: control target
= control target key end

     0   :  { %s131_s10 = smov 120   ;;  %s132_s11 = smov 104   ;;  %vm3_vm0 = vcmask 64512   ;;  %vm9_vm1 = vcmask 1048512   ;;  %vm15_vm2 = vcmask 982912   ;;  %vm21_vm3 = vcmask 917312   ;;  %s207_s0 = inlined_call_operand.vmem [shape: f32[16,8], index: 0, kind: input, shape index: {}]   ;;  %s208_s1 = inlined_call_operand.vmem [shape: f32[1,128], index: 1, kind: output, shape index: {}]  }
   0x1   :  { %v101_v0 = vld [vmem:[%s207_s0 + $0xf] sm:$0x1]   ;;  %v103_v1 = vld [vmem:[%s207_s0 + $0xd] sm:$0x1]   ;;  %v102_v2 = vld [vmem:[%s207_s0 + $0xe] sm:$0x1]  }
   0x2   :  { %7 = vrot.lane.b32.xlu0 %v101_v0, %s131_s10  ;;  %19 = vrot.lane.b32.xlu1 %v103_v1, %s132_s11  ;;  %v104_v3 = vld [vmem:[%s207_s0 + $0xc] sm:$0x1]   ;;  %s133_s16 = smov 112   ;;  %s134_s17 = smov 96   ;;  %v105_v4 = vld [vmem:[%s207_s0 + $0xb] sm:$0x1]  }
   0x3   :  { %v106_v5 = vld [vmem:[%s207_s0 + $0xa] sm:$0x1]   ;;  %v2_v6 = vld [vmem:[%s207_s0] sm:$0x1]   ;;  %s135_s24 = smov 88   ;;  %s136_s25 = smov 80  }
   0x4   :  { %4 = vst.msk [vmem:[#allocation0] sm:$0x1] %vm3_vm0, %v2_v6   ;;  %v107_v7 = vld [vmem:[%s207_s0 + $0x9] sm:$0x1]   ;;  %v108_v8 = vld [vmem:[%s207_s0 + $0x8] sm:$0x1]  }
   0x5   :  { %s137_s30 = smov 72   ;;  %s138_s2 = smov 64   ;;  %v109_v9 = vld [vmem:[%s207_s0 + $0x7] sm:$0x1]   ;;  %v110_v10 = vld [vmem:[%s207_s0 + $0x6] sm:$0x1]  }
   0x6   :  { %13 = vrot.lane.b32.xlu0 %v102_v2, %s133_s16  ;;  %25 = vrot.lane.b32.xlu1 %v104_v3, %s134_s17  ;;  %s139_s7 = smov 56   ;;  %s140_s8 = smov 48   ;;  %v111_v11 = vld [vmem:[%s207_s0 + $0x5] sm:$0x1]   ;;  %v112_v12 = vld [vmem:[%s207_s0 + $0x4] sm:$0x1]  }
   0x7   :  { %s141_s13 = smov 40   ;;  %s142_s14 = smov 32   ;;  %v113_v13 = vld [vmem:[%s207_s0 + $0x3] sm:$0x1]   ;;  %v114_v14 = vld [vmem:[%s207_s0 + $0x2] sm:$0x1]  }
   0x8   :  { %s143_s19 = smov 24   ;;  %s144_s20 = smov 16   ;;  %v115_v15 = vld [vmem:[%s207_s0 + $0x1] sm:$0x1]   ;;  %vm27_vm4 = vcmask 851712   ;;  %vm33_vm5 = vcmask 786112  }
   0x9   :  { %s145_s0 = smov 8   ;;  %vm39_vm6 = vcmask 720512   ;;  %vm45_vm7 = vcmask 654912   ;;  %vm51_vm8 = vcmask 589312   ;;  %vm57_vm9 = vcmask 523712  }
   0xa   :  { %31 = vrot.lane.b32.xlu0 %v105_v4, %s135_s24  ;;  %37 = vrot.lane.b32.xlu1 %v106_v5, %s136_s25  ;;  %vm63_vm10 = vcmask 458112   ;;  %vm69_vm11 = vcmask 392512   ;;  %vm75_vm12 = vcmask 326912   ;;  %vm81_vm13 = vcmask 261312  }
   0xb   :  { %vm87_vm14 = vcmask 195712   ;;  %vm93_vm15 = vcmask 130112  }
   0xe   :  { %43 = vrot.lane.b32.xlu0 %v107_v7, %s137_s30  ;;  %49 = vrot.lane.b32.xlu1 %v108_v8, %s138_s2 }
  0x12   :  { %55 = vrot.lane.b32.xlu0 %v109_v9, %s139_s7  ;;  %61 = vrot.lane.b32.xlu1 %v110_v10, %s140_s8 }
  0x16   :  { %67 = vrot.lane.b32.xlu0 %v111_v11, %s141_s13  ;;  %73 = vrot.lane.b32.xlu1 %v112_v12, %s142_s14 }
  0x1a   :  { %79 = vrot.lane.b32.xlu0 %v113_v13, %s143_s19  ;;  %85 = vrot.lane.b32.xlu1 %v114_v14, %s144_s20 }
  0x1e   :  { %91 = vrot.lane.b32.xlu0 %v115_v15, %s145_s0 }
  0x74   :  { %v8_v16 = vpop.permute.xlu0 %7   ;;  %v20_v17 = vpop.permute.xlu1 %19  }
  0x75   :  { %10 = vst.msk [vmem:[#allocation0] sm:$0x1] %vm9_vm1, %v8_v16  }
  0x78   :  { %v14_v18 = vpop.permute.xlu0 %13   ;;  %v26_v19 = vpop.permute.xlu1 %25  }
  0x79   :  { %16 = vst.msk [vmem:[#allocation0] sm:$0x1] %vm15_vm2, %v14_v18  }
  0x7a   :  { %22 = vst.msk [vmem:[#allocation0] sm:$0x1] %vm21_vm3, %v20_v17  }
  0x7b   :  { %28 = vst.msk [vmem:[#allocation0] sm:$0x1] %vm27_vm4, %v26_v19  }
  0x7c   :  { %v32_v20 = vpop.permute.xlu0 %31   ;;  %v38_v21 = vpop.permute.xlu1 %37  }
  0x7d   :  { %34 = vst.msk [vmem:[#allocation0] sm:$0x1] %vm33_vm5, %v32_v20  }
  0x7e   :  { %40 = vst.msk [vmem:[#allocation0] sm:$0x1] %vm39_vm6, %v38_v21  }
  0x80   :  { %v44_v22 = vpop.permute.xlu0 %43   ;;  %v50_v23 = vpop.permute.xlu1 %49  }
  0x81   :  { %46 = vst.msk [vmem:[#allocation0] sm:$0x1] %vm45_vm7, %v44_v22  }
  0x82   :  { %52 = vst.msk [vmem:[#allocation0] sm:$0x1] %vm51_vm8, %v50_v23  }
  0x84   :  { %v56_v24 = vpop.permute.xlu0 %55   ;;  %v62_v25 = vpop.permute.xlu1 %61  }
  0x85   :  { %58 = vst.msk [vmem:[#allocation0] sm:$0x1] %vm57_vm9, %v56_v24  }
  0x86   :  { %64 = vst.msk [vmem:[#allocation0] sm:$0x1] %vm63_vm10, %v62_v25  }
  0x88   :  { %v68_v26 = vpop.permute.xlu0 %67   ;;  %v74_v27 = vpop.permute.xlu1 %73  }
  0x89   :  { %70 = vst.msk [vmem:[#allocation0] sm:$0x1] %vm69_vm11, %v68_v26  }
  0x8a   :  { %76 = vst.msk [vmem:[#allocation0] sm:$0x1] %vm75_vm12, %v74_v27  }
  0x8c   :  { %v80_v28 = vpop.permute.xlu0 %79   ;;  %v86_v29 = vpop.permute.xlu1 %85  }
  0x8d   :  { %82 = vst.msk [vmem:[#allocation0] sm:$0x1] %vm81_vm13, %v80_v28  }
  0x8e   :  { %88 = vst.msk [vmem:[#allocation0] sm:$0x1] %vm87_vm14, %v86_v29  }
  0x90   :  { %v92_v30 = vpop.permute.xlu0 %91  }
  0x91   :  { %94 = vst.msk [vmem:[#allocation0] sm:$0x1] %vm93_vm15, %v92_v30  }
  0x98   :  { %v98_v31 = vld [vmem:[#allocation0] sm:$0x1] }
  0x99   :  { %100 = vst [vmem:[%s208_s1] sm:$0x1] %v98_v31 }

// kernel: residual_block_forward.1
= control target key start
LH: loop header
LB: loop body
LE: loop exit
PB: predicated region body
PF: predicated region fallthrough
CT: control target
= control target key end

     0   :  { %v1413_v0 = vmov 0   ;;  %v52_v36 = vlaneseq  ;;  %vm1415_vm2 = vmmov 0   ;;  %vm434_vm3 = vcmask 1040384   ;;  %s1904_s5 = inlined_call_operand.vmem [shape: f32[32,1], index: 5, kind: input, shape index: {}]   ;;  %s1905_s4 = inlined_call_operand.vmem [shape: f32[32,1], index: 4, kind: input, shape index: {}]   ;;  %s1906_s1 = inlined_call_operand.vmem [shape: bf16[384,128], index: 1, kind: input, shape index: {}]   ;;  %s1907_s0 = inlined_call_operand.vmem [shape: f32[32,128], index: 0, kind: input, shape index: {}]   ;;  %s1908_s3 = inlined_call_operand.vmem [shape: f32[128,128], index: 3, kind: input, shape index: {}]   ;;  %s1909_s2 = inlined_call_operand.vmem [shape: bf16[384,128], index: 2, kind: input, shape index: {}]   ;;  %s1910_s6 = inlined_call_operand.vmem [shape: f32[1,128], index: 6, kind: input, shape index: {}]   ;;  %s1911_s7 = inlined_call_operand.vmem [shape: f32[1,128], index: 7, kind: input, shape index: {}]   ;;  %s1912_s8 = inlined_call_operand.vmem [shape: f32[1,128], index: 8, kind: input, shape index: {}]   ;;  %s1913_s9 = inlined_call_operand.vmem [shape: f32[1,128], index: 9, kind: input, shape index: {}]   ;;  %s1914_s10 = inlined_call_operand.vmem [shape: f32[32,128], index: 10, kind: output, shape index: {}]  }
   0x1   :  { %1360 = vset.pattern.permute.xlu1 %v1413_v0  ;;  %1359 = vset.pattern.permute.xlu0 %v1413_v0  ;;  %v44_v1 = vld [vmem:[%s1904_s5] sm:$0xff]  ;;  %v45_v3 = vld [vmem:[%s1904_s5 + $0x8] sm:$0xff]  ;;  %v47_v6 = vld [vmem:[%s1904_s5 + $0x18] sm:$0xff] }
   0x2   :  { %v40_v2 = vld [vmem:[%s1905_s4] sm:$0xff]  ;;  %94 = vperm.xlu1 %1360, %v44_v1   ;;  %v41_v4 = vld [vmem:[%s1905_s4 + $0x8] sm:$0xff]  ;;  %v46_v7 = vld [vmem:[%s1904_s5 + $0x10] sm:$0xff]  ;;  %v1580_v37 = vshrl.u32 %v52_v36, 7 }
   0x3   :  { %61 = vperm.xlu0 %1359, %v40_v2   ;;  %v1361_v5 = vld [vmem:[%s1906_s1 + $0x40] sm:$0xff]   ;;  %v1363_v9 = vld [vmem:[%s1906_s1 + $0x48] sm:$0xff]   ;;  %v43_v12 = vld [vmem:[%s1905_s4 + $0x18] sm:$0xff] }
   0x4   :  { %v1362_v8 = vld [vmem:[%s1906_s1] sm:$0xff]   ;;  %1087 = vmatprep.subr.bf16.mxu0 %v1361_v5  ;;  %v1365_v11 = vld [vmem:[%s1906_s1 + $0x8] sm:$0xff]   ;;  %v42_v13 = vld [vmem:[%s1905_s4 + $0x10] sm:$0xff]  ;;  %vm87_vm0 = vcmp.lt.s32.totalorder %v1580_v37, 7  ;;  %vm54_vm1 = vcmp.lt.s32.totalorder %v1580_v37, 1 }
   0x5   :  { %v1364_v10 = vld [vmem:[%s1906_s1 + $0x80] sm:$0xff]   ;;  %1088 = vmatpush3.bf16.msra.mxu0 %v1362_v8  ;;  %v1366_v14 = vld [vmem:[%s1906_s1 + $0x50] sm:$0xff]   ;;  %v1367_v15 = vld [vmem:[%s1906_s1 + $0x88] sm:$0xff]  }
   0x6   :  { %99 = vperm.xlu1 %1360, %v45_v3   ;;  %1089 = vmatprep.subr.bf16.mxu0 %v1363_v9  ;;  %v1368_v16 = vld [vmem:[%s1906_s1 + $0x10] sm:$0xff]   ;;  %v1369_v17 = vld [vmem:[%s1906_s1 + $0x58] sm:$0xff]   ;;  %v1372_v21 = vld [vmem:[%s1906_s1 + $0x60] sm:$0xff]  }
   0x7   :  { %66 = vperm.xlu0 %1359, %v41_v4   ;;  %1197 = vmatprep.subr.bf16.mxu1 %v1364_v10  ;;  %v1370_v18 = vld [vmem:[%s1906_s1 + $0x90] sm:$0xff]   ;;  %v1371_v19 = vld [vmem:[%s1906_s1 + $0x18] sm:$0xff]   ;;  %v1374_v22 = vld [vmem:[%s1906_s1 + $0x20] sm:$0xff]  }
   0x8   :  { %1198 = vmatpush3.bf16.msra.mxu1 %v1364_v10  ;;  %v1373_v20 = vld [vmem:[%s1906_s1 + $0x98] sm:$0xff]   ;;  %v1375_v23 = vld [vmem:[%s1906_s1 + $0x68] sm:$0xff]   ;;  %v1376_v24 = vld [vmem:[%s1906_s1 + $0xa0] sm:$0xff]  }
   0x9   :  { %1090 = vmatpush3.bf16.msra.mxu0 %v1365_v11  ;;  %1199 = vmatprep.subr.bf16.mxu1 %v1367_v15  ;;  %v1547_v25 = vld [vmem:[%s1907_s0] sm:$0xff]  ;;  %v1552_v26 = vld [vmem:[%s1907_s0 + $0x8] sm:$0xff]  ;;  %v1378_v30 = vld [vmem:[%s1906_s1 + $0x70] sm:$0xff]  }
   0xa   :  { %109 = vperm.xlu1 %1360, %v47_v6   ;;  %1091 = vmatprep.subr.bf16.mxu0 %v1366_v14  ;;  %v117_v27 = vpack.c.bf16 %v1552_v26, %v1547_v25  ;;  %v1377_v28 = vld [vmem:[%s1906_s1 + $0x28] sm:$0xff]   ;;  %v1380_v31 = vld [vmem:[%s1906_s1 + $0x30] sm:$0xff]   ;;  %v1381_v33 = vld [vmem:[%s1906_s1 + $0x78] sm:$0xff]   ;;  %v83_v40 = vrot.slane %v1547_v25, 1  ;;  %v84_v41 = vrot.slane %v1552_v26, 1  ;;  %v48_v42 = vrot.slane %v1547_v25, 7 }
   0xb   :  { %104 = vperm.xlu0 %1359, %v46_v7   ;;  %v1379_v29 = vld [vmem:[%s1906_s1 + $0xa8] sm:$0xff]   ;;  %v1382_v32 = vld [vmem:[%s1906_s1 + $0xb0] sm:$0xff]   ;;  %v1383_v34 = vld [vmem:[%s1906_s1 + $0x38] sm:$0xff]   ;;  %v49_v45 = vrot.slane %v1552_v26, 7 }
   0xc   :  { %1200 = vmatpush3.bf16.msra.mxu1 %v1367_v15  ;;  %346 = vmatprep.mubr.bf16.mxu0 %v117_v27  ;;  %v1384_v35 = vld [vmem:[%s1906_s1 + $0xb8] sm:$0xff]   ;;  %v1590_v39 = vld [vmem:[%s1907_s0 + $0x10] sm:$0xff]  ;;  %v90_v48 = vsel %vm87_vm0, %v83_v40, %v84_v41  ;;  %v437_v14 = vld [vmem:[%s1908_s3 + $0x8] sm:$0xff] }
   0xd   :  { %1092 = vmatpush3.bf16.msra.mxu0 %v1368_v16  ;;  %1201 = vmatprep.subr.bf16.mxu1 %v1370_v18  ;;  %v1585_v38 = vld [vmem:[%s1907_s0 + $0x18] sm:$0xff]  ;;  %v85_v44 = vrot.slane %v1590_v39, 1  ;;  %v57_v51 = vsel %vm54_vm1, %v48_v42, %v49_v45  ;;  %v50_v61 = vrot.slane %v1590_v39, 7  ;;  %v1414_v16 = vmov 0.0|0.0  }
   0xe   :  { %76 = vperm.xlu1 %1360, %v43_v12   ;;  %1093 = vmatprep.subr.bf16.mxu0 %v1369_v17  ;;  %v51_v43 = vrot.slane %v1585_v38, 7  ;;  %v86_v52 = vrot.slane %v1585_v38, 1  ;;  %v120_v62 = vpack.c.bf16 %v1585_v38, %v1590_v39  ;;  %v438_v17 = vld [vmem:[%s1908_s3 + $0x10] sm:$0xff] }
   0xf   :  { %71 = vperm.xlu0 %1359, %v42_v13   ;;  %v89_v50 = vsel %vm87_vm0, %v84_v41, %v85_v44  ;;  %v56_v6 = vsel %vm54_vm1, %v49_v45, %v50_v61  ;;  %v436_v13 = vld [vmem:[%s1908_s3] sm:$0xff]  ;;  %v451_v41 = vld [vmem:[%s1908_s3 + $0x78] sm:$0xff] }
  0x10   :  { %1202 = vmatpush3.bf16.msra.mxu1 %v1370_v18  ;;  %v58_v49 = vsel %vm54_vm1, %v51_v43, %v48_v42  ;;  %v91_v59 = vsel %vm87_vm0, %v86_v52, %v83_v40  ;;  %v88_v60 = vsel %vm87_vm0, %v85_v44, %v86_v52  ;;  %v55_v5 = vsel %vm54_vm1, %v50_v61, %v51_v43  ;;  %v439_v18 = vld [vmem:[%s1908_s3 + $0x18] sm:$0xff]  ;;  %v450_v40 = vld [vmem:[%s1908_s3 + $0x70] sm:$0xff] }
  0x11   :  { %1094 = vmatpush3.bf16.msra.mxu0 %v1371_v19  ;;  %1203 = vmatprep.subr.bf16.mxu1 %v1373_v20  ;;  %v1650_v15 = vpack.c.bf16 %v437_v14, %v436_v13  ;;  %v1661_v19 = vpack.c.bf16 %v439_v18, %v438_v17  ;;  %v1416_v42 = vmov 0.0   ;;  %v1722_v43 = vpack.c.bf16 %v451_v41, %v450_v40 }
  0x12   :  { %1095 = vmatprep.subr.bf16.mxu0 %v1372_v21  ;;  %v441_v21 = vld [vmem:[%s1908_s3 + $0x28] sm:$0xff] }
  0x14   :  { %1204 = vmatpush3.bf16.msra.mxu1 %v1373_v20  ;;  %v440_v20 = vld [vmem:[%s1908_s3 + $0x20] sm:$0xff] }
  0x15   :  { %1096 = vmatpush3.bf16.msra.mxu0 %v1374_v22  ;;  %1205 = vmatprep.subr.bf16.mxu1 %v1376_v24  ;;  %v1671_v22 = vpack.c.bf16 %v441_v21, %v440_v20 }
  0x16   :  { %1097 = vmatprep.subr.bf16.mxu0 %v1375_v23  ;;  %v442_v23 = vld [vmem:[%s1908_s3 + $0x30] sm:$0xff] }
  0x18   :  { %1206 = vmatpush3.bf16.msra.mxu1 %v1376_v24  ;;  %v443_v24 = vld [vmem:[%s1908_s3 + $0x38] sm:$0xff] }
  0x19   :  { %1098 = vmatpush3.bf16.msra.mxu0 %v1377_v28  ;;  %1207 = vmatprep.subr.bf16.mxu1 %v1379_v29  ;;  %v1681_v27 = vpack.c.bf16 %v443_v24, %v442_v23  ;;  %v444_v28 = vld [vmem:[%s1908_s3 + $0x40] sm:$0xff] }
  0x1a   :  { %1099 = vmatprep.subr.bf16.mxu0 %v1378_v30 }
  0x1c   :  { %1208 = vmatpush3.bf16.msra.mxu1 %v1379_v29  ;;  %v445_v29 = vld [vmem:[%s1908_s3 + $0x48] sm:$0xff] }
  0x1d   :  { %1100 = vmatpush3.bf16.msra.mxu0 %v1380_v31  ;;  %1209 = vmatprep.subr.bf16.mxu1 %v1382_v32  ;;  %v1691_v30 = vpack.c.bf16 %v445_v29, %v444_v28  ;;  %v446_v31 = vld [vmem:[%s1908_s3 + $0x50] sm:$0xff] }
  0x1e   :  { %1101 = vmatprep.subr.bf16.mxu0 %v1381_v33 }
  0x20   :  { %1210 = vmatpush3.bf16.msra.mxu1 %v1382_v32  ;;  %v447_v32 = vld [vmem:[%s1908_s3 + $0x58] sm:$0xff] }
  0x21   :  { %1102 = vmatpush3.bf16.msra.mxu0 %v1383_v34  ;;  %1211 = vmatprep.subr.bf16.mxu1 %v1384_v35  ;;  %v1701_v33 = vpack.c.bf16 %v447_v32, %v446_v31  ;;  %v448_v34 = vld [vmem:[%s1908_s3 + $0x60] sm:$0xff] }
  0x22   :  { %1307 = vmatprep.subr.bf16.mxu0 %v1414_v16 }
  0x24   :  { %1212 = vmatpush3.bf16.msra.mxu1 %v1384_v35  ;;  %v449_v35 = vld [vmem:[%s1908_s3 + $0x68] sm:$0xff] }
  0x25   :  { %v1711_v36 = vpack.c.bf16 %v449_v35, %v448_v34 }
  0x81   :  { %v1600_v46 = vpop.permute.xlu1 %94 }
  0x82   :  { %v1602_v47 = vpop.permute.xlu0 %61  ;;  %v112_v55 = vmul.f32 %v1600_v46, %v90_v48 }
  0x83   :  { %v79_v56 = vmul.f32 %v1602_v47, %v58_v49 }
  0x85   :  { %v1613_v53 = vpop.permute.xlu1 %99 }
  0x86   :  { %v1615_v54 = vpop.permute.xlu0 %66  ;;  %v113_v57 = vmul.f32 %v1613_v53, %v89_v50 }
  0x87   :  { %v80_v58 = vmul.f32 %v1615_v54, %v57_v51 }
  0x88   :  { %v118_v0 = vpack.c.bf16 %v113_v57, %v112_v55 }
  0x89   :  { %v116_v63 = vpack.c.bf16 %v80_v58, %v79_v56  ;;  %v1628_v1 = vpop.permute.xlu1 %109 }
  0x8a   :  { %v1630_v2 = vpop.permute.xlu0 %104  ;;  %v115_v3 = vmul.f32 %v1628_v1, %v91_v59  ;;  %1213 = vmatprep.mubr.bf16.mxu1 %v118_v0 }
  0x8b   :  { %v114_v4 = vmul.f32 %v1630_v2, %v88_v60  ;;  %347 = vmatmul.mubr.bf16.vlgmr.msra.gmra.mrb[0].mxu0 %v116_v63 }
  0x8c   :  { %354 = vmatprep.mubr.bf16.mxu0 %v120_v62  ;;  %1309 = vmatpush3.bf16.msra.mxu0 %v1650_v15 }
  0x8d   :  { %v121_v7 = vpack.c.bf16 %v115_v3, %v114_v4  ;;  %v1638_v8 = vpop.permute.xlu1 %76  ;;  %1310 = vmatprep.subr.bf16.mxu0 %v1414_v16 }
  0x8e   :  { %v1640_v9 = vpop.permute.xlu0 %71  ;;  %v82_v10 = vmul.f32 %v1638_v8, %v55_v5 }
  0x8f   :  { %v81_v11 = vmul.f32 %v1640_v9, %v56_v6  ;;  %1214 = vmatmul.mubr.bf16.vlgmr.msra.gmra.mrb[0].mxu1 %v121_v7 }
  0x90   :  { %1312 = vmatpush3.bf16.msra.mxu0 %v1661_v19 }
  0x91   :  { %v119_v12 = vpack.c.bf16 %v82_v10, %v81_v11  ;;  %1313 = vmatprep.subr.bf16.mxu0 %v1414_v16 }
  0x93   :  { %355 = vmatmul.mubr.bf16.gmra.mrb[4].mxu0 %v119_v12 }
  0x94   :  { %1315 = vmatpush3.bf16.msra.mxu0 %v1671_v22  ;;  %1249 = vmatprep.mubr.msk.f32.mxu0 %vm1415_vm2, %v1416_v42 }
  0x95   :  { %1316 = vmatprep.subr.bf16.mxu0 %v1414_v16 }
  0x98   :  { %1318 = vmatpush3.bf16.msra.mxu0 %v1681_v27 }
  0x99   :  { %1319 = vmatprep.subr.bf16.mxu0 %v1414_v16 }
  0x9c   :  { %1321 = vmatpush3.bf16.msra.mxu0 %v1691_v30 }
  0x9d   :  { %1322 = vmatprep.subr.bf16.mxu0 %v1414_v16 }
  0xa0   :  { %1324 = vmatpush3.bf16.msra.mxu0 %v1701_v33 }
  0xa1   :  { %1325 = vmatprep.subr.bf16.mxu0 %v1414_v16 }
  0xa4   :  { %1327 = vmatpush3.bf16.msra.mxu0 %v1711_v36 }
  0xa5   :  { %1328 = vmatprep.subr.bf16.mxu0 %v1414_v16 }
  0xa8   :  { %1330 = vmatpush3.bf16.msra.mxu0 %v1722_v43 }
 0x15e   :  { %v1103_v44 = vpop.f32.mrb[0].mxu0 }
 0x15f   :  { %v1104_v45 = vpop.f32.mrb[1].mxu0 }
 0x160   :  { %v1105_v48 = vadd.f32 %v1104_v45, %v1103_v44  ;;  %v1106_v49 = vpop.f32.mrb[2].mxu0 }
 0x161   :  { %v1107_v50 = vpop.f32.mrb[3].mxu0 }
 0x162   :  { %v1108_v51 = vadd.f32 %v1107_v50, %v1106_v49  ;;  %v1215_v52 = vpop.f32.mrb[0].mxu1  ;;  %v1386_v49 = vld [vmem:[%s1909_s2] sm:$0xff]  }
 0x163   :  { %v397_v55 = vpop.f32.mrb[1].mxu1  ;;  %v1387_v50 = vld [vmem:[%s1909_s2 + $0x80] sm:$0xff]  }
 0x164   :  { %v1726_v56 = vadd.f32 %v1105_v48, %v397_v55  ;;  %v1216_v57 = vpop.f32.mrb[2].mxu1  ;;  %v1385_v48 = vld [vmem:[%s1909_s2 + $0x40] sm:$0xff]   ;;  %1252 = vmatprep.subr.bf16.mxu0 %v1387_v50  ;;  %v1390_v55 = vld [vmem:[%s1909_s2 + $0x88] sm:$0xff]  }
 0x165   :  { %v400_v58 = vpop.f32.mrb[3].mxu1  ;;  %1142 = vmatprep.subr.bf16.mxu1 %v1385_v48 }
 0x166   :  { %v1728_v59 = vadd.f32 %v1108_v51, %v400_v58  ;;  %v1109_v60 = vpop.f32.mrb[4].mxu0  ;;  %v421_v4 = vmul.f32 %v1726_v56, %v1726_v56  ;;  %1143 = vmatpush3.bf16.msra.mxu1 %v1386_v49  ;;  %v1388_v51 = vld [vmem:[%s1909_s2 + $0x48] sm:$0xff]   ;;  %v1392_v58 = vld [vmem:[%s1909_s2 + $0x10] sm:$0xff]  }
 0x167   :  { %v1110_v61 = vpop.f32.mrb[5].mxu0  ;;  %1144 = vmatprep.subr.bf16.mxu1 %v1388_v51 }
 0x168   :  { %v422_v62 = vmul.f32 %v1728_v59, %v1728_v59  ;;  %v1111_v63 = vadd.f32 %v1110_v61, %v1109_v60  ;;  %v1112_v0 = vpop.f32.mrb[6].mxu0  ;;  %v412_v5 = vadd.f32 %v1728_v59, %v1726_v56  ;;  %v1393_v60 = vld [vmem:[%s1909_s2 + $0x90] sm:$0xff]   ;;  %v1394_v61 = vld [vmem:[%s1909_s2 + $0x58] sm:$0xff]  }
 0x169   :  { %v1113_v3 = vpop.f32.mrb[7].mxu0 }
 0x16a   :  { %v1736_v6 = vadd.f32 %v1215_v52, %v1111_v63  ;;  %v1114_v7 = vadd.f32 %v1113_v3, %v1112_v0  ;;  %v425_v10 = vadd.f32 %v422_v62, %v421_v4  ;;  %v1389_v52 = vld [vmem:[%s1909_s2 + $0x8] sm:$0xff]   ;;  %v1395_v62 = vld [vmem:[%s1909_s2 + $0x18] sm:$0xff]   ;;  %v1397_v0 = vld [vmem:[%s1909_s2 + $0x60] sm:$0xff]  }
 0x16b   :  { %1145 = vmatpush3.bf16.msra.mxu1 %v1389_v52  ;;  %v1396_v63 = vld [vmem:[%s1909_s2 + $0x98] sm:$0xff]   ;;  %v1398_v3 = vld [vmem:[%s1909_s2 + $0x20] sm:$0xff]  }
 0x16c   :  { %v413_v11 = vadd.f32 %v412_v5, %v1736_v6  ;;  %v423_v12 = vmul.f32 %v1736_v6, %v1736_v6  ;;  %v1741_v13 = vadd.f32 %v1216_v57, %v1114_v7  ;;  %v1391_v57 = vld [vmem:[%s1909_s2 + $0x50] sm:$0xff]   ;;  %v1399_v4 = vld [vmem:[%s1909_s2 + $0xa0] sm:$0xff]   ;;  %v1400_v5 = vld [vmem:[%s1909_s2 + $0x68] sm:$0xff]  }
 0x16d   :  { %1146 = vmatprep.subr.bf16.mxu1 %v1391_v57  ;;  %v1401_v7 = vld [vmem:[%s1909_s2 + $0x28] sm:$0xff]   ;;  %v1060_v52 = vld [vmem:[%s1911_s7] ss:$0 sm:$0xff] }
 0x16e   :  { %v426_v14 = vadd.f32 %v425_v10, %v423_v12  ;;  %v414_v17 = vadd.f32 %v413_v11, %v1741_v13  ;;  %v424_v18 = vmul.f32 %v1741_v13, %v1741_v13  ;;  %v1402_v10 = vld [vmem:[%s1909_s2 + $0xa8] sm:$0xff]   ;;  %v1403_v11 = vld [vmem:[%s1909_s2 + $0x70] sm:$0xff]  }
 0x16f   :  { %1147 = vmatpush3.bf16.msra.mxu1 %v1392_v58  ;;  %v1405_v12 = vld [vmem:[%s1909_s2 + $0xb0] sm:$0xff]  }
 0x170   :  { %v415_v20 = vrot.slane %v414_v17, 4  ;;  %v427_v21 = vadd.f32 %v426_v14, %v424_v18  ;;  %1148 = vmatprep.subr.bf16.mxu1 %v1394_v61  ;;  %v1404_v14 = vld [vmem:[%s1909_s2 + $0x30] sm:$0xff]   ;;  %v1407_v18 = vld [vmem:[%s1909_s2 + $0x38] sm:$0xff]  }
 0x172   :  { %v416_v23 = vadd.f32 %v415_v20, %v414_v17  ;;  %v428_v24 = vrot.slane %v427_v21, 4  ;;  %v1406_v17 = vld [vmem:[%s1909_s2 + $0x78] sm:$0xff]  }
 0x173   :  { %1149 = vmatpush3.bf16.msra.mxu1 %v1395_v62  ;;  %v1408_v20 = vld [vmem:[%s1909_s2 + $0xb8] sm:$0xff]  }
 0x174   :  { %v417_v28 = vrot.slane %v416_v23, 2  ;;  %v429_v29 = vadd.f32 %v428_v24, %v427_v21  ;;  %1150 = vmatprep.subr.bf16.mxu1 %v1397_v0 }
 0x176   :  { %v418_v31 = vadd.f32 %v417_v28, %v416_v23  ;;  %v430_v32 = vrot.slane %v429_v29, 2 }
 0x177   :  { %1151 = vmatpush3.bf16.msra.mxu1 %v1398_v3 }
 0x178   :  { %v419_v34 = vrot.slane %v418_v31, 1  ;;  %v431_v35 = vadd.f32 %v430_v32, %v429_v29  ;;  %1152 = vmatprep.subr.bf16.mxu1 %v1400_v5  ;;  %v531_v32 = vsub.s32 0, %v1580_v37 }
 0x17a   :  { %v432_v40 = vrot.slane %v431_v35, 1  ;;  %v420_v41 = vadd.f32 %v419_v34, %v418_v31 }
 0x17b   :  { %1153 = vmatpush3.bf16.msra.mxu1 %v1401_v7 }
 0x17c   :  { %v433_v44 = vadd.f32 %v432_v40, %v431_v35  ;;  %1154 = vmatprep.subr.bf16.mxu1 %v1403_v11  ;;  %v1059_v35 = vld [vmem:[%s1910_s6] ss:$0 sm:$0xff]  ;;  %v547_v40 = vsub.s32 1, %v1580_v37 }
 0x17e   :  { %v435_v45 = vsel %vm434_vm3, %v420_v41, %v433_v44 }
 0x17f   :  { %1250 = vmatmul.mubr.f32.vlgmr.msra.gmra.mrb[8].mxu0 %v435_v45  ;;  %1155 = vmatpush3.bf16.msra.mxu1 %v1404_v14 }
 0x180   :  { %1253 = vmatpush3.bf16.msra.mxu0 %v1387_v50  ;;  %1156 = vmatprep.subr.bf16.mxu1 %v1406_v17 }
 0x181   :  { %1254 = vmatprep.subr.bf16.mxu0 %v1390_v55 }
 0x183   :  { %1157 = vmatpush3.bf16.msra.mxu1 %v1407_v18 }
 0x184   :  { %1255 = vmatpush3.bf16.msra.mxu0 %v1390_v55  ;;  %1331 = vmatprep.subr.bf16.mxu1 %v1414_v16 }
 0x185   :  { %1256 = vmatprep.subr.bf16.mxu0 %v1393_v60 }
 0x188   :  { %1257 = vmatpush3.bf16.msra.mxu0 %v1393_v60 }
 0x189   :  { %1258 = vmatprep.subr.bf16.mxu0 %v1396_v63 }
 0x18c   :  { %1259 = vmatpush3.bf16.msra.mxu0 %v1396_v63 }
 0x18d   :  { %1260 = vmatprep.subr.bf16.mxu0 %v1399_v4 }
 0x190   :  { %1261 = vmatpush3.bf16.msra.mxu0 %v1399_v4 }
 0x191   :  { %1262 = vmatprep.subr.bf16.mxu0 %v1402_v10 }
 0x194   :  { %1263 = vmatpush3.bf16.msra.mxu0 %v1402_v10 }
 0x195   :  { %1264 = vmatprep.subr.bf16.mxu0 %v1405_v12 }
 0x198   :  { %1265 = vmatpush3.bf16.msra.mxu0 %v1405_v12 }
 0x199   :  { %1266 = vmatprep.subr.bf16.mxu0 %v1408_v20 }
 0x19c   :  { %1267 = vmatpush3.bf16.msra.mxu0 %v1408_v20 }
 0x252   :  { %v518_v21 = vpop.f32.mrb[8].mxu0 }
 0x253   :  { %v522_v23 = vmul.f32 %v518_v21, %v518_v21  ;;  %v1251_v24 = vpop.f32.mrb[9].mxu0  ;;  %v532_v34 = vrot.slane %v518_v21, %v531_v32 }
 0x255   :  { %v524_v28 = vrot.slane %v522_v23, 7  ;;  %v533_v45 = vsub.f32 %v1726_v56, %v532_v34  ;;  %v534_v48 = vsub.f32 %v1728_v59, %v532_v34  ;;  %v535_v49 = vsub.f32 %v1736_v6, %v532_v34 }
 0x256   :  { %v536_v50 = vsub.f32 %v1741_v13, %v532_v34 }
 0x257   :  { %v526_v29 = vsub.f32 %v518_v21, %v524_v28 }
 0x259   :  { %v527_v31 = vadd.f32 1e-05, %v526_v29 }
 0x25b   :  { %1409 = vrsqrt.f32 %v527_v31 }
 0x265   :  { %v1410_v41 = vpop.eup %1409 }
 0x266   :  { %v544_v44 = vmul.f32 %v1410_v41, %v1059_v35 }
 0x268   :  { %v548_v51 = vrot.slane %v544_v44, %v547_v40 }
 0x26a   :  { %v551_v55 = vmul.f32 %v548_v51, %v535_v49  ;;  %v552_v57 = vmul.f32 %v548_v51, %v536_v50  ;;  %v549_v58 = vmul.f32 %v548_v51, %v533_v45  ;;  %v550_v60 = vmul.f32 %v548_v51, %v534_v48 }
 0x26c   :  { %v560_v61 = vadd.f32 %v1060_v52, %v549_v58  ;;  %v561_v62 = vadd.f32 %v1060_v52, %v550_v60  ;;  %v563_v56 = vadd.f32 %v1060_v52, %v552_v57  ;;  %v562_v63 = vadd.f32 %v1060_v52, %v551_v55 }
 0x26e   :  { %v564_v59 = vmax.f32 %v560_v61, 0.0  ;;  %v565_v0 = vmax.f32 %v561_v62, 0.0  ;;  %v567_v6 = vmax.f32 %v563_v56, 0.0  ;;  %v566_v3 = vmax.f32 %v562_v63, 0.0 }
 0x270   :  { %v568_v13 = vrot.slane %v564_v59, 7  ;;  %v569_v4 = vrot.slane %v565_v0, 7  ;;  %v593_v5 = vpack.c.bf16 %v565_v0, %v564_v59  ;;  %v571_v7 = vrot.slane %v567_v6, 7 }
 0x271   :  { %v580_v10 = vrot.slane %v564_v59, 1  ;;  %v581_v11 = vrot.slane %v565_v0, 1  ;;  %v582_v12 = vrot.slane %v566_v3, 1  ;;  %v583_v18 = vrot.slane %v567_v6, 1 }
 0x272   :  { %822 = vmatprep.mubr.bf16.mxu1 %v593_v5  ;;  %v574_v14 = vsel %vm54_vm1, %v568_v13, %v569_v4  ;;  %v575_v17 = vsel %vm54_vm1, %v571_v7, %v568_v13  ;;  %v570_v20 = vrot.slane %v566_v3, 7  ;;  %v596_v45 = vpack.c.bf16 %v567_v6, %v566_v3 }
 0x273   :  { %v576_v21 = vmul.f32 %v575_v17, %v1602_v47  ;;  %v577_v23 = vmul.f32 %v574_v14, %v1615_v54  ;;  %v585_v24 = vsel %vm87_vm0, %v581_v11, %v582_v12  ;;  %v586_v28 = vsel %vm87_vm0, %v580_v10, %v581_v11 }
 0x274   :  { %v588_v29 = vmul.f32 %v586_v28, %v1600_v46  ;;  %v589_v31 = vmul.f32 %v585_v24, %v1613_v53  ;;  %v584_v34 = vsel %vm87_vm0, %v582_v12, %v583_v18  ;;  %v587_v35 = vsel %vm87_vm0, %v583_v18, %v580_v10 }
 0x275   :  { %v592_v41 = vpack.c.bf16 %v577_v23, %v576_v21  ;;  %v590_v47 = vmul.f32 %v584_v34, %v1630_v2  ;;  %v591_v54 = vmul.f32 %v587_v35, %v1628_v1  ;;  %v572_v48 = vsel %vm54_vm1, %v570_v20, %v571_v7 }
 0x276   :  { %v594_v44 = vpack.c.bf16 %v589_v31, %v588_v29  ;;  %v573_v46 = vsel %vm54_vm1, %v569_v4, %v570_v20  ;;  %v579_v50 = vmul.f32 %v572_v48, %v1638_v8 }
 0x277   :  { %823 = vmatmul.mubr.bf16.vlgmr.msra.gmra.mrb[4].mxu1 %v592_v41  ;;  %v597_v53 = vpack.c.bf16 %v591_v54, %v590_v47  ;;  %v578_v49 = vmul.f32 %v573_v46, %v1640_v9 }
 0x278   :  { %1268 = vmatprep.mubr.bf16.mxu0 %v594_v44  ;;  %830 = vmatprep.mubr.bf16.mxu1 %v596_v45  ;;  %v1085_v45 = vld [vmem:[%s1912_s8] ss:$0 sm:$0xff] }
 0x279   :  { %1269 = vmatmul.mubr.bf16.vlgmr.msra.gmra.mrb[12].mxu0 %v597_v53  ;;  %1333 = vmatpush3.bf16.msra.mxu1 %v1650_v15  ;;  %v595_v1 = vpack.c.bf16 %v579_v50, %v578_v49 }
 0x27a   :  { %1334 = vmatprep.subr.bf16.mxu1 %v1414_v16 }
 0x27d   :  { %1336 = vmatpush3.bf16.msra.mxu1 %v1661_v19 }
 0x27e   :  { %1337 = vmatprep.subr.bf16.mxu1 %v1414_v16 }
 0x27f   :  { %831 = vmatmul.mubr.bf16.gmra.mrb[8].mxu1 %v595_v1 }
 0x280   :  { %1304 = vmatprep.mubr.msk.f32.mxu1 %vm1415_vm2, %v1416_v42 }
 0x281   :  { %1339 = vmatpush3.bf16.msra.mxu1 %v1671_v22 }
 0x282   :  { %1340 = vmatprep.subr.bf16.mxu1 %v1414_v16 }
 0x285   :  { %1342 = vmatpush3.bf16.msra.mxu1 %v1681_v27 }
 0x286   :  { %1343 = vmatprep.subr.bf16.mxu1 %v1414_v16 }
 0x289   :  { %1345 = vmatpush3.bf16.msra.mxu1 %v1691_v30 }
 0x28a   :  { %1346 = vmatprep.subr.bf16.mxu1 %v1414_v16 }
 0x28d   :  { %1348 = vmatpush3.bf16.msra.mxu1 %v1701_v33 }
 0x28e   :  { %1349 = vmatprep.subr.bf16.mxu1 %v1414_v16 }
 0x291   :  { %1351 = vmatpush3.bf16.msra.mxu1 %v1711_v36 }
 0x292   :  { %1352 = vmatprep.subr.bf16.mxu1 %v1414_v16 }
 0x295   :  { %1354 = vmatpush3.bf16.msra.mxu1 %v1722_v43 }
 0x34a   :  { %v1158_v2 = vpop.f32.mrb[4].mxu1 }
 0x34b   :  { %v1159_v8 = vpop.f32.mrb[5].mxu1 }
 0x34c   :  { %v1160_v9 = vadd.f32 %v1159_v8, %v1158_v2  ;;  %v1270_v15 = vpop.f32.mrb[12].mxu0  ;;  %v1161_v19 = vpop.f32.mrb[6].mxu1  ;;  %v1086_v8 = vld [vmem:[%s1913_s9] ss:$0 sm:$0xff] }
 0x34d   :  { %v873_v22 = vpop.f32.mrb[13].mxu0  ;;  %v1162_v27 = vpop.f32.mrb[7].mxu1 }
 0x34e   :  { %v874_v30 = vadd.f32 %v1160_v9, %v873_v22  ;;  %v1163_v42 = vadd.f32 %v1162_v27, %v1161_v19  ;;  %v1271_v51 = vpop.f32.mrb[14].mxu0 }
 0x34f   :  { %v876_v52 = vpop.f32.mrb[15].mxu0 }
 0x350   :  { %v877_v33 = vadd.f32 %v1163_v42, %v876_v52  ;;  %v897_v61 = vmul.f32 %v874_v30, %v874_v30 }
 0x352   :  { %v1164_v55 = vpop.f32.mrb[8].mxu1  ;;  %v898_v58 = vmul.f32 %v877_v33, %v877_v33  ;;  %v888_v43 = vadd.f32 %v877_v33, %v874_v30 }
 0x353   :  { %v1165_v57 = vpop.f32.mrb[9].mxu1 }
 0x354   :  { %v1166_v36 = vadd.f32 %v1165_v57, %v1164_v55  ;;  %v1167_v60 = vpop.f32.mrb[10].mxu1  ;;  %v901_v63 = vadd.f32 %v898_v58, %v897_v61 }
 0x355   :  { %v1168_v16 = vpop.f32.mrb[11].mxu1 }
 0x356   :  { %v882_v62 = vadd.f32 %v1270_v15, %v1166_v36  ;;  %v1169_v56 = vadd.f32 %v1168_v16, %v1167_v60 }
 0x358   :  { %v889_v59 = vadd.f32 %v888_v43, %v882_v62  ;;  %v899_v0 = vmul.f32 %v882_v62, %v882_v62  ;;  %v885_v6 = vadd.f32 %v1271_v51, %v1169_v56 }
 0x35a   :  { %v902_v3 = vadd.f32 %v901_v63, %v899_v0  ;;  %v890_v13 = vadd.f32 %v889_v59, %v885_v6  ;;  %v900_v4 = vmul.f32 %v885_v6, %v885_v6 }
 0x35c   :  { %v891_v5 = vrot.slane %v890_v13, 4  ;;  %v903_v7 = vadd.f32 %v902_v3, %v900_v4 }
 0x35e   :  { %v892_v10 = vadd.f32 %v891_v5, %v890_v13  ;;  %v904_v11 = vrot.slane %v903_v7, 4 }
 0x360   :  { %v893_v12 = vrot.slane %v892_v10, 2  ;;  %v905_v14 = vadd.f32 %v904_v11, %v903_v7 }
 0x362   :  { %v894_v17 = vadd.f32 %v893_v12, %v892_v10  ;;  %v906_v18 = vrot.slane %v905_v14, 2 }
 0x364   :  { %v895_v20 = vrot.slane %v894_v17, 1  ;;  %v907_v21 = vadd.f32 %v906_v18, %v905_v14 }
 0x366   :  { %v908_v23 = vrot.slane %v907_v21, 1  ;;  %v896_v24 = vadd.f32 %v895_v20, %v894_v17 }
 0x368   :  { %v909_v28 = vadd.f32 %v908_v23, %v907_v21 }
 0x36a   :  { %v910_v29 = vsel %vm434_vm3, %v896_v24, %v909_v28 }
 0x36b   :  { %1305 = vmatmul.mubr.f32.vlgmr.msra.gmra.mrb[12].mxu1 %v910_v29 }
 0x43e   :  { %v977_v31 = vpop.f32.mrb[12].mxu1 }
 0x43f   :  { %v981_v34 = vmul.f32 %v977_v31, %v977_v31  ;;  %v1306_v35 = vpop.f32.mrb[13].mxu1  ;;  %v991_v44 = vrot.slane %v977_v31, %v531_v32 }
 0x441   :  { %v983_v41 = vrot.slane %v981_v34, 7  ;;  %v992_v53 = vsub.f32 %v874_v30, %v991_v44  ;;  %v993_v49 = vsub.f32 %v877_v33, %v991_v44  ;;  %v994_v50 = vsub.f32 %v882_v62, %v991_v44 }
 0x442   :  { %v995_v1 = vsub.f32 %v885_v6, %v991_v44 }
 0x443   :  { %v985_v47 = vsub.f32 %v977_v31, %v983_v41 }
 0x445   :  { %v986_v54 = vadd.f32 1e-05, %v985_v47 }
 0x447   :  { %1411 = vrsqrt.f32 %v986_v54 }
 0x451   :  { %v1412_v48 = vpop.eup %1411 }
 0x452   :  { %v1003_v46 = vmul.f32 %v1412_v48, %v1085_v45 }
 0x454   :  { %v1007_v2 = vrot.slane %v1003_v46, %v547_v40 }
 0x456   :  { %v1008_v9 = vmul.f32 %v1007_v2, %v992_v53  ;;  %v1009_v15 = vmul.f32 %v1007_v2, %v993_v49  ;;  %v1010_v32 = vmul.f32 %v1007_v2, %v994_v50  ;;  %v1011_v19 = vmul.f32 %v1007_v2, %v995_v1 }
 0x458   :  { %v1019_v22 = vadd.f32 %v1086_v8, %v1008_v9  ;;  %v1020_v27 = vadd.f32 %v1086_v8, %v1009_v15  ;;  %v1021_v42 = vadd.f32 %v1086_v8, %v1010_v32  ;;  %v1022_v51 = vadd.f32 %v1086_v8, %v1011_v19 }
 0x45a   :  { %v1023_v30 = vadd.f32 %v1019_v22, %v1547_v25  ;;  %v1024_v52 = vadd.f32 %v1020_v27, %v1552_v26  ;;  %v1025_v33 = vadd.f32 %v1021_v42, %v1590_v39  ;;  %v1026_v37 = vadd.f32 %v1022_v51, %v1585_v38 }
 0x45c   :  { %1027 = vst [vmem:[%s1914_s10] sm:$0xff] %v1023_v30  ;;  %1028 = vst [vmem:[%s1914_s10 + $0x8] sm:$0xff] %v1024_v52 }
 0x45d   :  { %1029 = vst [vmem:[%s1914_s10 + $0x10] sm:$0xff] %v1025_v33  ;;  %1030 = vst [vmem:[%s1914_s10 + $0x18] sm:$0xff] %v1026_v37 }

</bundles_post_ra>
